<compile_context>
chip_gen: v7x
topology: tpu7x:2x2x1
jax: 0.10.0
libtpu: 0.0.40
codegen_flags: <defaults>
</compile_context>

<pallas_src>
import math

import jax
import jax.numpy as jnp
from jax.experimental import pallas as pl
from jax.experimental.pallas import tpu as pltpu


_LANE = 128      # vreg lane width
_TM_MAX = 4096   # row-tile cap (multiple of 8); fits comfortably in VMEM on all gens


def _make_kernel(n_layers, dropout_p):
    """Build the prenet kernel for a static layer count / dropout rate."""
    dropout_p = float(dropout_p)
    drop_all = dropout_p >= 1.0
    use_dropout = dropout_p > 0.0
    inv_keep = 0.0 if drop_all else 1.0 / (1.0 - dropout_p)
    # 24-bit threshold: drop iff hash24 < thresh  =>  P(drop) = thresh / 2^24.
    thresh24 = min(int(round(dropout_p * (1 << 24))), (1 << 24) - 1)

    def kernel(seed_ref, x_ref, *refs):
        # refs = (w0, b0, ..., w_{L-1}, b_{L-1}, w_proj, b_proj, out)
        out_ref = refs[-1]
        params = refs[:-1]

        h = x_ref[...].astype(jnp.float32)

        if n_layers > 0 and use_dropout and not drop_all:
            tm = x_ref.shape[0]
            u = params[0].shape[1]
            # Global element coordinates + seed -> hash base (hoisted out of loop).
            row0 = (pl.program_id(0) * tm).astype(jnp.uint32)
            rows = jax.lax.broadcasted_iota(jnp.int32, (tm, u), 0).astype(jnp.uint32) + row0
            cols = jax.lax.broadcasted_iota(jnp.int32, (tm, u), 1).astype(jnp.uint32)
            seed_u = seed_ref[0].astype(jnp.uint32)
            base = ((rows * jnp.uint32(0x9E3779B1))
                    ^ (cols * jnp.uint32(0x85EBCA77))
                    ^ (seed_u * jnp.uint32(0xC2B2AE35)))
            keep_scale = jnp.float32(inv_keep)

            def dropout(v, salt):
                # Counter-based hash (lowbias32-style avalanche), salted per call
                # so every dropout application draws an independent mask.
                b = base + jnp.uint32((salt * 0x9E3779B9) & 0xFFFFFFFF)
                b = b ^ (b >> 16)
                b = b * jnp.uint32(0x7FEB352D)
                b = b ^ (b >> 15)
                b = b * jnp.uint32(0x846CA68B)
                b = b ^ (b >> 16)
                h24 = (b >> 8).astype(jnp.int32)           # uniform in [0, 2^24)
                keep = h24 >= jnp.int32(thresh24)          # P(keep) = 1 - p
                return jnp.where(keep, v * keep_scale, jnp.zeros_like(v))
        elif drop_all:
            def dropout(v, salt):
                return jnp.zeros_like(v)
        else:
            def dropout(v, salt):
                return v

        for layer in range(n_layers):
            w = params[2 * layer][...]
            b = params[2 * layer + 1][...]                 # (1, U), broadcasts over rows
            h = jnp.dot(h.astype(w.dtype), w,
                        preferred_element_type=jnp.float32) + b.astype(jnp.float32)
            h = dropout(h, 2 * layer + 1)                  # dropout after Linear
            h = dropout(jnp.maximum(h, 0.0), 2 * layer + 2)  # dropout after ReLU

        w = params[-2][...]
        b = params[-1][...]
        out = jnp.dot(h.astype(w.dtype), w,
                      preferred_element_type=jnp.float32) + b.astype(jnp.float32)
        out_ref[...] = out.astype(out_ref.dtype)

    return kernel


def _pad_params(params, n_layers, lane=_LANE):
    """Zero-pad the hidden width (n_units) up to a multiple of `lane` lanes.

    Exact: padded weight rows/cols and bias entries are zero, so padded lanes
    stay identically zero through Linear/ReLU/dropout and contribute nothing.
    Biases are reshaped to (1, out) so they live in 2-D VMEM tiles.
    """
    if n_layers == 0:
        w, b = params
        return [w, b.reshape(1, -1)]
    n_units = params[0].shape[1]
    u_pad = -(-n_units // lane) * lane
    out = []
    for i in range(n_layers):
        w, b = params[2 * i], params[2 * i + 1]
        d_in = w.shape[0] if i == 0 else u_pad
        wp = jnp.zeros((d_in, u_pad), w.dtype).at[: w.shape[0], : w.shape[1]].set(w)
        bp = jnp.zeros((1, u_pad), b.dtype).at[0, : b.shape[0]].set(b)
        out += [wp, bp]
    w, b = params[-2], params[-1]
    wp = jnp.zeros((u_pad, w.shape[1]), w.dtype).at[: w.shape[0], :].set(w)
    out += [wp, b.reshape(1, -1)]
    return out


def decoder_prenet(x, params, dropout_p, seed=0):
    """Run the DecoderPrenet forward pass.

    x:       (B, T, input_dim)
    params:  flat list [w0, b0, ..., w_{L-1}, b_{L-1}, w_proj, b_proj]; weights
             stored as (in, out) so the kernel computes h @ W (== torch Linear).
    """
    B, T, F = x.shape
    M = B * T
    x2 = x.reshape(M, F)                       # keep caller dtype (bf16 I/O works)

    n_layers = (len(params) - 2) // 2
    attention_dim = params[-2].shape[-1]

    flat = _pad_params(params, n_layers)
    seed_arr = jnp.asarray([seed], dtype=jnp.int32)

    # Row tiling: weights stay VMEM-resident; x/out tiles stream (double-buffered).
    if M <= _TM_MAX:
        tm, grid_m = M, 1
    else:
        tm, grid_m = _TM_MAX, pl.cdiv(M, _TM_MAX)

    kernel = _make_kernel(n_layers, float(dropout_p))

    resident = lambda i, s: (0, 0)             # same block every grid step
    in_specs = (
        [pl.BlockSpec((tm, F), lambda i, s: (i, 0))]             # x row tile
        + [pl.BlockSpec(p.shape, resident) for p in flat]        # weights/biases
    )
    out_specs = pl.BlockSpec((tm, attention_dim), lambda i, s: (i, 0))

    itemsize = x.dtype.itemsize
    flops = sum(2 * M * w.shape[0] * w.shape[1] for w in flat[0::2])
    bytes_accessed = (M * F * itemsize
                      + M * attention_dim * itemsize
                      + sum(int(p.size) * p.dtype.itemsize for p in flat))

    out = pl.pallas_call(
        kernel,
        out_shape=jax.ShapeDtypeStruct((M, attention_dim), x.dtype),
        grid_spec=pltpu.PrefetchScalarGridSpec(
            num_scalar_prefetch=1,             # seed -> SMEM, passed to index_maps
            grid=(grid_m,),
            in_specs=in_specs,
            out_specs=out_specs,
        ),
        compiler_params=pltpu.CompilerParams(
            dimension_semantics=("parallel",),
            vmem_limit_bytes=32 * 1024 * 1024,
        ),
        cost_estimate=pl.CostEstimate(
            flops=flops, transcendentals=0, bytes_accessed=bytes_accessed
        ),
    )(seed_arr, x2, *flat)

    return out.reshape(B, T, attention_dim)


def init_params(key, input_dim, attention_dim, n_units, n_layers):
    """Deterministic torch.nn.Linear-style init (U[-1/sqrt(fan_in), 1/sqrt(fan_in)])."""
    params = []
    d_in = input_dim
    for _ in range(n_layers):
        key, kw, kb = jax.random.split(key, 3)
        bound = 1.0 / math.sqrt(d_in)
        params.append(jax.random.uniform(kw, (d_in, n_units), jnp.float32, -bound, bound))
        params.append(jax.random.uniform(kb, (n_units,), jnp.float32, -bound, bound))
        d_in = n_units
    key, kw, kb = jax.random.split(key, 3)
    bound = 1.0 / math.sqrt(d_in)
    params.append(jax.random.uniform(kw, (d_in, attention_dim), jnp.float32, -bound, bound))
    params.append(jax.random.uniform(kb, (attention_dim,), jnp.float32, -bound, bound))
    return params


if __name__ == "__main__":
    # Small config consistent with the module's forward:
    #   input_dim (mel bands) = 32, n_units = 64, attention_dim = 128,
    #   n_layers = 2, dropout = 0.5; input (B=2, T=8, input_dim).
    input_dim, attention_dim, n_units, n_layers, dropout_p = 32, 128, 64, 2, 0.5
    B, T = 2, 8

    key = jax.random.PRNGKey(0)
    key, kx = jax.random.split(key)
    x = jax.random.normal(kx, (B, T, input_dim), dtype=jnp.float32)
    params = init_params(key, input_dim, attention_dim, n_units, n_layers)

    # Sanity check (dropout disabled) against a pure-JAX reference.
    out_nd = jax.block_until_ready(decoder_prenet(x, params, 0.0, seed=0))
    ref = x.reshape(-1, input_dim)
    for i in range(n_layers):
        ref = jnp.maximum(ref @ params[2 * i] + params[2 * i + 1], 0.0)
    ref = (ref @ params[-2] + params[-1]).reshape(B, T, attention_dim)
    assert out_nd.shape == (B, T, attention_dim), out_nd.shape
    assert bool(jnp.allclose(out_nd, ref, atol=1e-1, rtol=1e-1)), \
        float(jnp.max(jnp.abs(out_nd - ref)))

    # Full forward with dropout active (training=True semantics of the module).
    out = jax.block_until_ready(decoder_prenet(x, params, dropout_p, seed=0))
    assert out.shape == (B, T, attention_dim), out.shape
    assert bool(jnp.all(jnp.isfinite(out)))
    print("KERNEL_OK")
</pallas_src>

<mosaic_0001>
module attributes {stable_mosaic.version = 11 : i64} {
  func.func @kernel(%arg0: i32, %arg1: memref<1xi32, #tpu.memory_space<smem>>, %arg2: memref<16x32xf32, #tpu.memory_space<vmem>>, %arg3: memref<32x128xf32, #tpu.memory_space<vmem>>, %arg4: memref<1x128xf32, #tpu.memory_space<vmem>>, %arg5: memref<128x128xf32, #tpu.memory_space<vmem>>, %arg6: memref<1x128xf32, #tpu.memory_space<vmem>>, %arg7: memref<128x128xf32, #tpu.memory_space<vmem>>, %arg8: memref<1x128xf32, #tpu.memory_space<vmem>>, %arg9: memref<16x128xf32, #tpu.memory_space<vmem>>) attributes {dimension_semantics = [#tpu.dimension_semantics<parallel>], iteration_bounds = array<i64: 1>, scalar_prefetch = 1 : i64, scratch_operands = 0 : i64, tpu.core_type = #tpu.core_type<tc>, window_params = [{transform_indices = @transform_0, window_bounds = array<i64: 16, 32>}, {pipeline_mode = #tpu.pipeline_mode<synchronous>, transform_indices = @transform_1, window_bounds = array<i64: 32, 128>}, {pipeline_mode = #tpu.pipeline_mode<synchronous>, transform_indices = @transform_2, window_bounds = array<i64: 1, 128>}, {pipeline_mode = #tpu.pipeline_mode<synchronous>, transform_indices = @transform_3, window_bounds = array<i64: 128, 128>}, {pipeline_mode = #tpu.pipeline_mode<synchronous>, transform_indices = @transform_4, window_bounds = array<i64: 1, 128>}, {pipeline_mode = #tpu.pipeline_mode<synchronous>, transform_indices = @transform_5, window_bounds = array<i64: 128, 128>}, {pipeline_mode = #tpu.pipeline_mode<synchronous>, transform_indices = @transform_6, window_bounds = array<i64: 1, 128>}, {transform_indices = @transform_7, window_bounds = array<i64: 16, 128>}]} {
    %c0 = arith.constant 0 : index
    %c0_0 = arith.constant 0 : index
    %0 = vector.load %arg2[%c0, %c0_0] : memref<16x32xf32, #tpu.memory_space<vmem>>, vector<16x32xf32>
    %c0_1 = arith.constant 0 : index
    %c0_2 = arith.constant 0 : index
    %1 = vector.load %arg3[%c0_1, %c0_2] : memref<32x128xf32, #tpu.memory_space<vmem>>, vector<32x128xf32>
    %c0_3 = arith.constant 0 : index
    %c0_4 = arith.constant 0 : index
    %2 = vector.load %arg4[%c0_3, %c0_4] : memref<1x128xf32, #tpu.memory_space<vmem>>, vector<1x128xf32>
    %cst = arith.constant dense<0.000000e+00> : vector<16x128xf32>
    %3 = tpu.matmul %0, %1, %cst {dimension_numbers = #tpu.dot_dimension_numbers<[1], [0], [0], [1], [0, 0, 1, 1], [], []>} : vector<16x32xf32>, vector<32x128xf32>, vector<16x128xf32> -> vector<16x128xf32>
    %4 = vector.broadcast %2 : vector<1x128xf32> to vector<16x128xf32>
    %5 = arith.addf %3, %4 : vector<16x128xf32>
    %cst_5 = arith.constant 0.000000e+00 : f32
    %6 = vector.broadcast %cst_5 : f32 to vector<16x128xf32>
    %7 = arith.maximumf %5, %6 : vector<16x128xf32>
    %c0_6 = arith.constant 0 : index
    %c0_7 = arith.constant 0 : index
    %8 = vector.load %arg5[%c0_6, %c0_7] : memref<128x128xf32, #tpu.memory_space<vmem>>, vector<128x128xf32>
    %c0_8 = arith.constant 0 : index
    %c0_9 = arith.constant 0 : index
    %9 = vector.load %arg6[%c0_8, %c0_9] : memref<1x128xf32, #tpu.memory_space<vmem>>, vector<1x128xf32>
    %cst_10 = arith.constant dense<0.000000e+00> : vector<16x128xf32>
    %10 = tpu.matmul %7, %8, %cst_10 {dimension_numbers = #tpu.dot_dimension_numbers<[1], [0], [0], [1], [0, 0, 1, 1], [], []>} : vector<16x128xf32>, vector<128x128xf32>, vector<16x128xf32> -> vector<16x128xf32>
    %11 = vector.broadcast %9 : vector<1x128xf32> to vector<16x128xf32>
    %12 = arith.addf %10, %11 : vector<16x128xf32>
    %cst_11 = arith.constant 0.000000e+00 : f32
    %13 = vector.broadcast %cst_11 : f32 to vector<16x128xf32>
    %14 = arith.maximumf %12, %13 : vector<16x128xf32>
    %c0_12 = arith.constant 0 : index
    %c0_13 = arith.constant 0 : index
    %15 = vector.load %arg7[%c0_12, %c0_13] : memref<128x128xf32, #tpu.memory_space<vmem>>, vector<128x128xf32>
    %c0_14 = arith.constant 0 : index
    %c0_15 = arith.constant 0 : index
    %16 = vector.load %arg8[%c0_14, %c0_15] : memref<1x128xf32, #tpu.memory_space<vmem>>, vector<1x128xf32>
    %cst_16 = arith.constant dense<0.000000e+00> : vector<16x128xf32>
    %17 = tpu.matmul %14, %15, %cst_16 {dimension_numbers = #tpu.dot_dimension_numbers<[1], [0], [0], [1], [0, 0, 1, 1], [], []>} : vector<16x128xf32>, vector<128x128xf32>, vector<16x128xf32> -> vector<16x128xf32>
    %18 = vector.broadcast %16 : vector<1x128xf32> to vector<16x128xf32>
    %19 = arith.addf %17, %18 : vector<16x128xf32>
    %c0_17 = arith.constant 0 : index
    %c0_18 = arith.constant 0 : index
    %20 = vector.load %arg9[%c0_17, %c0_18] : memref<16x128xf32, #tpu.memory_space<vmem>>, vector<16x128xf32>
    tpu.vector_store %arg9[%c0_17, %c0_18], %19 {strides = array<i32>} : memref<16x128xf32, #tpu.memory_space<vmem>>, vector<16x128xf32>,
    return
  }
  func.func @transform_0(%arg0: i32, %arg1: memref<1xi32, #tpu.memory_space<smem>>) -> (i32, i32) {
    %c0_i32 = arith.constant 0 : i32
    %c0_i32_0 = arith.constant 0 : i32
    return %arg0, %c0_i32 : i32, i32
  }
  func.func @transform_1(%arg0: i32, %arg1: memref<1xi32, #tpu.memory_space<smem>>) -> (i32, i32) {
    %c0_i32 = arith.constant 0 : i32
    %c0_i32_0 = arith.constant 0 : i32
    %c0_i32_1 = arith.constant 0 : i32
    return %c0_i32, %c0_i32_0 : i32, i32
  }
  func.func @transform_2(%arg0: i32, %arg1: memref<1xi32, #tpu.memory_space<smem>>) -> (i32, i32) {
    %c0_i32 = arith.constant 0 : i32
    %c0_i32_0 = arith.constant 0 : i32
    %c0_i32_1 = arith.constant 0 : i32
    return %c0_i32, %c0_i32_0 : i32, i32
  }
  func.func @transform_3(%arg0: i32, %arg1: memref<1xi32, #tpu.memory_space<smem>>) -> (i32, i32) {
    %c0_i32 = arith.constant 0 : i32
    %c0_i32_0 = arith.constant 0 : i32
    %c0_i32_1 = arith.constant 0 : i32
    return %c0_i32, %c0_i32_0 : i32, i32
  }
  func.func @transform_4(%arg0: i32, %arg1: memref<1xi32, #tpu.memory_space<smem>>) -> (i32, i32) {
    %c0_i32 = arith.constant 0 : i32
    %c0_i32_0 = arith.constant 0 : i32
    %c0_i32_1 = arith.constant 0 : i32
    return %c0_i32, %c0_i32_0 : i32, i32
  }
  func.func @transform_5(%arg0: i32, %arg1: memref<1xi32, #tpu.memory_space<smem>>) -> (i32, i32) {
    %c0_i32 = arith.constant 0 : i32
    %c0_i32_0 = arith.constant 0 : i32
    %c0_i32_1 = arith.constant 0 : i32
    return %c0_i32, %c0_i32_0 : i32, i32
  }
  func.func @transform_6(%arg0: i32, %arg1: memref<1xi32, #tpu.memory_space<smem>>) -> (i32, i32) {
    %c0_i32 = arith.constant 0 : i32
    %c0_i32_0 = arith.constant 0 : i32
    %c0_i32_1 = arith.constant 0 : i32
    return %c0_i32, %c0_i32_0 : i32, i32
  }
  func.func @transform_7(%arg0: i32, %arg1: memref<1xi32, #tpu.memory_space<smem>>) -> (i32, i32) {
    %c0_i32 = arith.constant 0 : i32
    %c0_i32_0 = arith.constant 0 : i32
    return %arg0, %c0_i32 : i32, i32
  }
}

</mosaic_0001>

<bundles_post_ra>
// kernel: tpu_custom_call.1
= control target key start
LH: loop header
LB: loop body
LE: loop exit
PB: predicated region body
PF: predicated region fallthrough
CT: control target
= control target key end

     0   :  { %14 = vsyncpa [#allocation5], 0  ;;  %s877_s0 = inlined_call_operand.<no memory space> [shape: s32[1], index: 0, kind: input, shape index: {}]   ;;  %s878_s1 = inlined_call_operand.hbm [shape: f32[16,32], index: 1, kind: input, shape index: {}]   ;;  %s879_s2 = inlined_call_operand.hbm [shape: f32[32,128], index: 2, kind: input, shape index: {}]   ;;  %s880_s3 = inlined_call_operand.vmem [shape: f32[1,128], index: 3, kind: input, shape index: {}]   ;;  %s881_s4 = inlined_call_operand.hbm [shape: f32[128,128], index: 4, kind: input, shape index: {}]   ;;  %s882_s5 = inlined_call_operand.vmem [shape: f32[1,128], index: 5, kind: input, shape index: {}]   ;;  %s883_s6 = inlined_call_operand.hbm [shape: f32[128,128], index: 6, kind: input, shape index: {}]   ;;  %s884_s7 = inlined_call_operand.vmem [shape: f32[1,128], index: 7, kind: input, shape index: {}]   ;;  %s885_s8 = inlined_call_operand.hbm [shape: f32[16,128], index: 8, kind: output, shape index: {}]  }
   0x1   :  { %15 = vsyncpa [#allocation8], 0 }
   0x2   :  { %16 = vsyncpa [#allocation11], 0 }
   0x3   :  { %17 = vsyncpa [#allocation6], 0  ;;  %s725_s26 = smov [#allocation7]   ;;  %s726_s28 = smov [#allocation4]  }
   0x4   :  { %s35_s27 = sshll.u32 %s725_s26, 4  ;;  %s23_s29 = sshll.u32 %s726_s28, 4  ;;  %s36_s27 = int_to_ptr.vmem [resolvable:$true] %s35_s27  ;;  %s777_s29 = int_to_ptr.vmem [resolvable:$true] %s23_s29 }
   0x5   :  { %s607_s10 = scalar_lea.hbm %s879_s2, 512 }
   0x6   :  { %p608_p0 = scmp.ne.s32.totalorder %s879_s2, %s607_s10  ;;  %p611_p1 = scmp.lt.u32.totalorder %s607_s10, %s879_s2 }
   0x8   :  { %p613_p2 = pnand %p611_p1, %p608_p0 }
   0xa   :  { %616 = shalt.err (!%p613_p2)
}
   0xb   :  { %s617_s15 = scalar_lea.vmem %s36_s27, 512  ;;  %p622_p4 = scmp.lt.s32.totalorder %s36_s27, %s36_s27 }
   0xc   :  { %p618_p3 = scmp.ne.s32.totalorder %s36_s27, %s617_s15  ;;  %p623_p5 = scmp.lt.s32.totalorder %s617_s15, %s617_s15 }
   0xe   :  { %p624_p6 = por %p623_p5, %p622_p4 }
  0x10   :  { %p625_p7 = pnand %p624_p6, %p618_p3 }
  0x12   :  { %628 = shalt.err (!%p625_p7)
}
  0x13   :  { %s727_s16 = smov 128   ;;  %s728_s17 = smov 8  }
  0x14   :  { %41 = dma.hbm_to_vmem [thread:$0]  %s879_s2, 512, %s36_s27, [#allocation8], %s727_s16, %s727_s16, %s728_s17  }
  0x15   :  { %s629_s22 = scalar_lea.hbm %s878_s1, 256 }
  0x16   :  { %p630_p8 = scmp.ne.s32.totalorder %s878_s1, %s629_s22  ;;  %p633_p9 = scmp.lt.u32.totalorder %s629_s22, %s878_s1 }
  0x18   :  { %p635_p10 = pnand %p633_p9, %p630_p8 }
  0x1a   :  { %638 = shalt.err (!%p635_p10)
}
  0x1b   :  { %s639_s26 = scalar_lea.vmem %s777_s29, 256  ;;  %p644_p12 = scmp.lt.s32.totalorder %s777_s29, %s777_s29 }
  0x1c   :  { %p640_p11 = scmp.ne.s32.totalorder %s777_s29, %s639_s26  ;;  %p645_p13 = scmp.lt.s32.totalorder %s639_s26, %s639_s26 }
  0x1e   :  { %p646_p0 = por %p645_p13, %p644_p12 }
  0x20   :  { %p647_p1 = pnand %p646_p0, %p640_p11 }
  0x22   :  { %650 = shalt.err (!%p647_p1)
}
  0x23   :  { %29 = dma.hbm_to_vmem [thread:$0]  %s878_s1, 256, %s777_s29, [#allocation5], %s727_s16, %s727_s16, %s728_s17  }
  0x24   :  { %s729_s28 = smov [#allocation9]   ;;  %s730_s9 = smov [#allocation10]  }
  0x25   :  { %s49_s30 = sshll.u32 %s729_s28, 4  ;;  %s63_s10 = sshll.u32 %s730_s9, 4  ;;  %s50_s30 = int_to_ptr.vmem [resolvable:$true] %s49_s30  ;;  %s814_s10 = int_to_ptr.vmem [resolvable:$true] %s63_s10 }
  0x26   :  { %s651_s13 = scalar_lea.hbm %s881_s4, 2048 }
  0x27   :  { %p652_p2 = scmp.ne.s32.totalorder %s881_s4, %s651_s13  ;;  %p655_p3 = scmp.lt.u32.totalorder %s651_s13, %s881_s4 }
  0x29   :  { %p657_p4 = pnand %p655_p3, %p652_p2 }
  0x2b   :  { %660 = shalt.err (!%p657_p4)
}
  0x2c   :  { %s661_s1 = scalar_lea.vmem %s50_s30, 2048  ;;  %p666_p6 = scmp.lt.s32.totalorder %s50_s30, %s50_s30 }
  0x2d   :  { %p662_p5 = scmp.ne.s32.totalorder %s50_s30, %s661_s1  ;;  %p667_p7 = scmp.lt.s32.totalorder %s661_s1, %s661_s1 }
  0x2f   :  { %p668_p8 = por %p667_p7, %p666_p6 }
  0x31   :  { %p669_p9 = pnand %p668_p8, %p662_p5 }
  0x33   :  { %672 = shalt.err (!%p669_p9)
}
  0x34   :  { %55 = dma.hbm_to_vmem [thread:$0]  %s881_s4, 2048, %s50_s30, [#allocation8], %s727_s16, %s727_s16, %s728_s17  }
  0x35   :  { %s673_s23 = scalar_lea.hbm %s883_s6, 2048 }
  0x36   :  { %p674_p10 = scmp.ne.s32.totalorder %s883_s6, %s673_s23  ;;  %p677_p11 = scmp.lt.u32.totalorder %s673_s23, %s883_s6 }
  0x38   :  { %p679_p12 = pnand %p677_p11, %p674_p10 }
  0x3a   :  { %682 = shalt.err (!%p679_p12)
}
  0x3b   :  { %s683_s2 = scalar_lea.vmem %s814_s10, 2048  ;;  %p688_p0 = scmp.lt.s32.totalorder %s814_s10, %s814_s10 }
  0x3c   :  { %p684_p13 = scmp.ne.s32.totalorder %s814_s10, %s683_s2  ;;  %p689_p1 = scmp.lt.s32.totalorder %s683_s2, %s683_s2 }
  0x3e   :  { %p690_p2 = por %p689_p1, %p688_p0 }
  0x40   :  { %p691_p3 = pnand %p690_p2, %p684_p13 }
  0x42   :  { %694 = shalt.err (!%p691_p3)
}
  0x43   :  { %69 = dma.hbm_to_vmem [thread:$0]  %s883_s6, 2048, %s814_s10, [#allocation11], %s727_s16, %s727_s16, %s728_s17  }
  0x44   :  { %717 = dma.done.wait [#allocation5], 256  }
  0x45   :  { %718 = vsyncadd [#allocation5], 4294967040 }
  0x46   :  { %719 = dma.done.wait [#allocation8], 2560  }
  0x47   :  { %720 = vsyncadd [#allocation8], 4294964736 }
  0x48   :  { %721 = dma.done.wait [#allocation11], 2048  }
  0x49   :  { %722 = vsyncadd [#allocation11], 4294965248  ;;  %vm97_vm0 = vcmask 261120   ;;  %v86_v0 = vld [vmem:[#allocation7] sm:$0xff]  ;;  %v87_v1 = vld [vmem:[#allocation7 + $0x8] sm:$0xff]  ;;  %s731_s11 = smov [#allocation12]  }
  0x4a   :  { %v88_v2 = vld [vmem:[#allocation7 + $0x10] sm:$0xff]  ;;  %v528_v3 = vpack.c.bf16 %v87_v1, %v86_v0  ;;  %v89_v4 = vld [vmem:[#allocation7 + $0x18] sm:$0xff]  ;;  %v181_v7 = vld [vmem:[#allocation9] sm:$0xff]  ;;  %s386_s12 = sshll.u32 %s731_s11, 4  ;;  %s387_s12 = int_to_ptr.vmem [resolvable:$true] %s386_s12 }
  0x4b   :  { %v84_v5 = vld [vmem:[#allocation4] sm:$0xff]  ;;  %v532_v6 = vpack.c.bf16 %v89_v4, %v88_v2  ;;  %v182_v8 = vld [vmem:[#allocation9 + $0x8] sm:$0xff]  ;;  %v184_v11 = vld [vmem:[#allocation9 + $0x18] sm:$0xff]  ;;  %p700_p5 = scmp.lt.s32.totalorder %s387_s12, %s387_s12 }
  0x4c   :  { %455 = vmatprep.mubr.msk.f32.mxu0 %vm97_vm0, %v84_v5  ;;  %v183_v9 = vld [vmem:[#allocation9 + $0x10] sm:$0xff]  ;;  %529 = vmatprep.subr.bf16.mxu0 %v528_v3  ;;  %v536_v10 = vpack.c.bf16 %v182_v8, %v181_v7  ;;  %v185_v13 = vld [vmem:[#allocation9 + $0x20] sm:$0xff]  ;;  %v186_v14 = vld [vmem:[#allocation9 + $0x28] sm:$0xff] }
  0x4d   :  { %531 = vmatpush3.bf16.msra.mxu0 %v528_v3  ;;  %v540_v12 = vpack.c.bf16 %v184_v11, %v183_v9  ;;  %v544_v15 = vpack.c.bf16 %v186_v14, %v185_v13  ;;  %v85_v16 = vld [vmem:[#allocation4 + $0x8] sm:$0xff]  ;;  %v187_v17 = vld [vmem:[#allocation9 + $0x30] sm:$0xff]  ;;  %v189_v20 = vld [vmem:[#allocation9 + $0x40] sm:$0xff] }
  0x4e   :  { %533 = vmatprep.subr.bf16.mxu0 %v532_v6  ;;  %537 = vmatprep.subr.bf16.mxu1 %v536_v10  ;;  %v188_v18 = vld [vmem:[#allocation9 + $0x38] sm:$0xff]  ;;  %v190_v21 = vld [vmem:[#allocation9 + $0x48] sm:$0xff]  ;;  %v191_v23 = vld [vmem:[#allocation9 + $0x50] sm:$0xff] }
  0x4f   :  { %539 = vmatpush3.bf16.msra.mxu1 %v536_v10  ;;  %v548_v19 = vpack.c.bf16 %v188_v18, %v187_v17  ;;  %v552_v22 = vpack.c.bf16 %v190_v21, %v189_v20  ;;  %v192_v24 = vld [vmem:[#allocation9 + $0x58] sm:$0xff]  ;;  %v193_v26 = vld [vmem:[#allocation9 + $0x60] sm:$0xff]  ;;  %v194_v27 = vld [vmem:[#allocation9 + $0x68] sm:$0xff] }
  0x50   :  { %541 = vmatprep.subr.bf16.mxu1 %v540_v12  ;;  %v556_v25 = vpack.c.bf16 %v192_v24, %v191_v23  ;;  %v560_v28 = vpack.c.bf16 %v194_v27, %v193_v26  ;;  %v195_v29 = vld [vmem:[#allocation9 + $0x70] sm:$0xff]  ;;  %v196_v30 = vld [vmem:[#allocation9 + $0x78] sm:$0xff]  ;;  %v281_v32 = vld [vmem:[#allocation10] sm:$0xff] }
  0x51   :  { %535 = vmatpush3.bf16.msra.mxu0 %v532_v6  ;;  %v564_v31 = vpack.c.bf16 %v196_v30, %v195_v29  ;;  %v282_v33 = vld [vmem:[#allocation10 + $0x8] sm:$0xff]  ;;  %v283_v34 = vld [vmem:[#allocation10 + $0x10] sm:$0xff]  ;;  %v284_v36 = vld [vmem:[#allocation10 + $0x18] sm:$0xff] }
  0x52   :  { %v568_v35 = vpack.c.bf16 %v282_v33, %v281_v32  ;;  %v572_v37 = vpack.c.bf16 %v284_v36, %v283_v34  ;;  %v285_v38 = vld [vmem:[#allocation10 + $0x20] sm:$0xff]  ;;  %v286_v39 = vld [vmem:[#allocation10 + $0x28] sm:$0xff]  ;;  %v287_v41 = vld [vmem:[#allocation10 + $0x30] sm:$0xff] }
  0x53   :  { %543 = vmatpush3.bf16.msra.mxu1 %v540_v12  ;;  %v576_v40 = vpack.c.bf16 %v286_v39, %v285_v38  ;;  %v288_v42 = vld [vmem:[#allocation10 + $0x38] sm:$0xff]  ;;  %v289_v44 = vld [vmem:[#allocation10 + $0x40] sm:$0xff]  ;;  %v290_v45 = vld [vmem:[#allocation10 + $0x48] sm:$0xff] }
  0x54   :  { %456 = vmatmul.mubr.msk.f32.vlgmr.msra.gmra.mrb[0].mxu0 %vm97_vm0, %v85_v16  ;;  %545 = vmatprep.subr.bf16.mxu1 %v544_v15  ;;  %v580_v43 = vpack.c.bf16 %v288_v42, %v287_v41  ;;  %v584_v46 = vpack.c.bf16 %v290_v45, %v289_v44  ;;  %v291_v47 = vld [vmem:[#allocation10 + $0x50] sm:$0xff]  ;;  %v292_v48 = vld [vmem:[#allocation10 + $0x58] sm:$0xff]  ;;  %v293_v50 = vld [vmem:[#allocation10 + $0x60] sm:$0xff] }
  0x55   :  { %569 = vmatprep.subr.bf16.mxu0 %v568_v35  ;;  %v588_v49 = vpack.c.bf16 %v292_v48, %v291_v47  ;;  %v294_v51 = vld [vmem:[#allocation10 + $0x68] sm:$0xff]  ;;  %v400_v53 = vld [vmem:[%s880_s3] ss:$0 sm:$0xff]  ;;  %v296_v61 = vld [vmem:[#allocation10 + $0x78] sm:$0xff] }
  0x56   :  { %571 = vmatpush3.bf16.msra.mxu0 %v568_v35  ;;  %v592_v52 = vpack.c.bf16 %v294_v51, %v293_v50  ;;  %v295_v60 = vld [vmem:[#allocation10 + $0x70] sm:$0xff] }
  0x57   :  { %547 = vmatpush3.bf16.msra.mxu1 %v544_v15  ;;  %573 = vmatprep.subr.bf16.mxu0 %v572_v37  ;;  %v596_v62 = vpack.c.bf16 %v296_v61, %v295_v60  ;;  %v403_v63 = vld [vmem:[%s882_s5] ss:$0 sm:$0xff]  ;;  %s695_s5 = scalar_lea.vmem %s387_s12, 256 }
  0x58   :  { %549 = vmatprep.subr.bf16.mxu1 %v548_v19  ;;  %v404_v6 = vld [vmem:[%s884_s7] ss:$0 sm:$0xff]  ;;  %p696_p4 = scmp.ne.s32.totalorder %s387_s12, %s695_s5  ;;  %p701_p6 = scmp.lt.s32.totalorder %s695_s5, %s695_s5 }
  0x5a   :  { %575 = vmatpush3.bf16.msra.mxu0 %v572_v37  ;;  %p702_p7 = por %p701_p6, %p700_p5 }
  0x5b   :  { %551 = vmatpush3.bf16.msra.mxu1 %v548_v19  ;;  %577 = vmatprep.subr.bf16.mxu0 %v576_v40 }
  0x5c   :  { %553 = vmatprep.subr.bf16.mxu1 %v552_v22  ;;  %p703_p8 = pnand %p702_p7, %p696_p4 }
  0x5e   :  { %579 = vmatpush3.bf16.msra.mxu0 %v576_v40 }
  0x5f   :  { %555 = vmatpush3.bf16.msra.mxu1 %v552_v22  ;;  %581 = vmatprep.subr.bf16.mxu0 %v580_v43 }
  0x60   :  { %557 = vmatprep.subr.bf16.mxu1 %v556_v25 }
  0x62   :  { %583 = vmatpush3.bf16.msra.mxu0 %v580_v43 }
  0x63   :  { %559 = vmatpush3.bf16.msra.mxu1 %v556_v25  ;;  %585 = vmatprep.subr.bf16.mxu0 %v584_v46 }
  0x64   :  { %561 = vmatprep.subr.bf16.mxu1 %v560_v28 }
  0x66   :  { %587 = vmatpush3.bf16.msra.mxu0 %v584_v46 }
  0x67   :  { %563 = vmatpush3.bf16.msra.mxu1 %v560_v28  ;;  %589 = vmatprep.subr.bf16.mxu0 %v588_v49 }
  0x68   :  { %565 = vmatprep.subr.bf16.mxu1 %v564_v31 }
  0x6a   :  { %591 = vmatpush3.bf16.msra.mxu0 %v588_v49 }
  0x6b   :  { %567 = vmatpush3.bf16.msra.mxu1 %v564_v31  ;;  %593 = vmatprep.subr.bf16.mxu0 %v592_v52 }
  0x6e   :  { %595 = vmatpush3.bf16.msra.mxu0 %v592_v52 }
  0x6f   :  { %597 = vmatprep.subr.bf16.mxu0 %v596_v62 }
  0x72   :  { %599 = vmatpush3.bf16.msra.mxu0 %v596_v62 }
 0x127   :  { %v457_v54 = vpop.f32.mrb[0].mxu0 }
 0x128   :  { %v176_v55 = vadd.f32 %v457_v54, %v400_v53  ;;  %v170_v56 = vpop.f32.mrb[1].mxu0 }
 0x129   :  { %v171_v57 = vadd.f32 %v400_v53, %v170_v56 }
 0x12a   :  { %v180_v59 = vmax.f32 %v176_v55, 0.0 }
 0x12b   :  { %v179_v58 = vmax.f32 %v171_v57, 0.0 }
 0x12d   :  { %490 = vmatprep.mubr.f32.mxu1 %v179_v58 }
 0x12e   :  { %491 = vmatmul.mubr.f32.vlgmr.msra.gmra.mrb[0].mxu1 %v180_v59 }
 0x201   :  { %v492_v0 = vpop.f32.mrb[0].mxu1 }
 0x202   :  { %v276_v1 = vadd.f32 %v492_v0, %v403_v63  ;;  %v270_v2 = vpop.f32.mrb[1].mxu1 }
 0x203   :  { %v271_v3 = vadd.f32 %v403_v63, %v270_v2 }
 0x204   :  { %v280_v5 = vmax.f32 %v276_v1, 0.0 }
 0x205   :  { %v279_v4 = vmax.f32 %v271_v3, 0.0 }
 0x207   :  { %525 = vmatprep.mubr.f32.mxu0 %v279_v4 }
 0x208   :  { %526 = vmatmul.mubr.f32.vlgmr.msra.gmra.mrb[2].mxu0 %v280_v5 }
 0x2db   :  { %v527_v7 = vpop.f32.mrb[2].mxu0 }
 0x2dc   :  { %v376_v8 = vadd.f32 %v527_v7, %v404_v6  ;;  %v370_v9 = vpop.f32.mrb[3].mxu0 }
 0x2dd   :  { %v371_v10 = vadd.f32 %v404_v6, %v370_v9 }
 0x2de   :  { %380 = vst [vmem:[#allocation12 + $0x8] sm:$0xff] %v376_v8 }
 0x2df   :  { %379 = vst [vmem:[#allocation12] sm:$0xff] %v371_v10 }
 0x2e0   :  { %706 = shalt.err (!%p703_p8)
}
 0x2e1   :  { %s707_s7 = scalar_lea.hbm %s885_s8, 256 }
 0x2e2   :  { %p708_p9 = scmp.ne.s32.totalorder %s885_s8, %s707_s7  ;;  %p711_p10 = scmp.lt.u32.totalorder %s707_s7, %s885_s8 }
 0x2e4   :  { %p713_p11 = pnand %p711_p10, %p708_p9 }
 0x2e6   :  { %716 = shalt.err (!%p713_p11)
}
 0x2e7   :  { %392 = dma.vmem_to_hbm [thread:$0]  %s387_s12, 256, %s885_s8, [#allocation6], %s727_s16, %s727_s16, %s728_s17  }
 0x2e8   :  { %723 = dma.done.wait [#allocation6], 256  }
 0x2e9   :  { %724 = vsyncadd [#allocation6], 4294967040 }
 0x2ea   :  { %396 = vsyncpa [#allocation5], 1 }
 0x2eb   :  { %397 = vsyncpa [#allocation8], 1 }
 0x2ec   :  { %398 = vsyncpa [#allocation11], 1 }
 0x2ed   :  { %399 = vsyncpa [#allocation6], 1 }

</bundles_post_ra>
